<compile_context>
chip_gen: v6e
topology: v6e:2x2x1
jax: 0.10.0
libtpu: 0.0.40
codegen_flags: <defaults>
</compile_context>

<pallas_src>
import jax
import jax.numpy as jnp
from jax import lax
from jax.experimental import pallas as pl
from jax.experimental.pallas import tpu as pltpu


# ---------------------------------------------------------------------------
# Generation-aware VMEM sizing
# ---------------------------------------------------------------------------
def _vmem_caps():
    """(physical VMEM bytes, per-step working-set budget)."""
    cap = 64 * 1024 * 1024            # conservative default (v7x per-TC VMEM)
    try:
        info = pltpu.get_tpu_info()
        c = getattr(info, "vmem_capacity_bytes", None)
        if c:
            cap = int(c)
    except Exception:
        pass
    # ~60% of physical: ~77 MiB on v5e/v6e (128 MiB), ~38 MiB on v7x (64 MiB).
    return cap, (cap * 3) // 5


def _vmem_estimate(TH, W, C, O, K, in_bytes):
    """Per-step VMEM working set (double-buffered I/O + f32 temporaries)."""
    P = K // 2
    db_in = 2 * in_bytes * W * (TH * C + 2 * P * C)      # x block + halo blocks
    db_out = 2 * in_bytes * TH * W * O                   # output block
    wts = 4 * (K * K * C + C * O + O)                    # weights + fused bias
    temps = 4 * TH * W * ((K + 3) * C + 2 * O)           # windows/partials/acc/y
    return db_in + db_out + wts + temps


def _pick_block_h(H, W, C, O, K, in_bytes, n_batch):
    """Largest row tile that divides H, respects halo blocking, fits VMEM."""
    P = K // 2
    cands = [th for th in range(1, H + 1)
             if H % th == 0 and (P == 0 or th % P == 0)]
    _, budget = _vmem_caps()
    fit = [th for th in cands if _vmem_estimate(th, W, C, O, K, in_bytes) <= budget]
    th = fit[-1] if fit else cands[0]
    # Keep at least 2 grid steps so both v7x TensorCores get work.
    while n_batch * (H // th) < 2:
        smaller = [c for c in cands if c < th]
        if not smaller:
            break
        th = smaller[-1]
    return th


# ---------------------------------------------------------------------------
# Kernel
# ---------------------------------------------------------------------------
def _make_kernel(TH, W, C, O, K, use_mxu, mxu_dtype):
    P = K // 2

    def shift_w(v, d):
        """result[:, w, :] == v[:, w + d, :], zero outside [0, W)."""
        if d == 0:
            return v
        z = jnp.zeros((TH, abs(d), C), jnp.float32)
        if d > 0:
            return jnp.concatenate([v[:, d:, :], z], axis=1)
        return jnp.concatenate([z, v[:, :W + d, :]], axis=1)

    def pointwise_and_store(acc, pw_ref, b_ref, o_ref):
        b = b_ref[...]                                    # (1, O)
        if use_mxu:
            pw = pw_ref[...]                              # (C, O)
            a = acc
            if mxu_dtype is not None:                     # bf16 MXU operands
                a, pw = a.astype(mxu_dtype), pw.astype(mxu_dtype)
            if W % 8 == 0:
                y = jnp.dot(a.reshape(TH * W, C), pw,
                            preferred_element_type=jnp.float32)
                y = (y + b).reshape(TH, W, O)
            else:
                y = jnp.einsum('hwc,co->hwo', a, pw,
                               preferred_element_type=jnp.float32) + b
        else:
            # Tiny-channel path: unrolled lane-broadcast multiplies on the VPU
            # (exact f32; the MXU would be mostly fill/drain at C, O << 128).
            y = None
            for c in range(C):
                term = acc[:, :, c:c + 1] * pw_ref[c:c + 1, :]
                y = term if y is None else y + term
            y = y + b
        o_ref[0] = y.astype(o_ref.dtype)

    if P == 0:
        # 1x1 depthwise: no halo inputs at all.
        def kernel_1x1(x_ref, dw_ref, pw_ref, b_ref, o_ref):
            acc = x_ref[0].astype(jnp.float32) * dw_ref[0, 0:1, :]
            pointwise_and_store(acc, pw_ref, b_ref, o_ref)
        return kernel_1x1

    def kernel(x_ref, top_ref, bot_ref, dw_ref, pw_ref, b_ref, o_ref):
        t = pl.program_id(1)
        last = pl.num_programs(1) - 1

        x_rows = x_ref[0].astype(jnp.float32)                         # (TH, W, C)
        # Border halos: jnp.where (not *0.0) so NaN/Inf in clamped rows can't leak.
        top = jnp.where(t > 0, top_ref[0].astype(jnp.float32), 0.0)   # (P, W, C)
        bot = jnp.where(t < last, bot_ref[0].astype(jnp.float32), 0.0)

        def window(kh):
            """Rows x_ext[r + kh - P], r in [0, TH): leading-axis concat only."""
            d = kh - P
            if d == 0:
                return x_rows
            if d < 0:
                return jnp.concatenate([top[P + d:], x_rows[:TH + d]], axis=0)
            return jnp.concatenate([x_rows[d:], bot[:d]], axis=0)

        # Depthwise KxK, reordered: reduce over kh first, then one W shift per
        # column offset (K-1 shifts total instead of K*(K-1)).
        parts = [None] * K              # parts[kw] = sum_kh window(kh) * w[kh, kw]
        for kh in range(K):
            rows = window(kh)
            for kw in range(K):
                term = rows * dw_ref[kh, kw:kw + 1, :]
                parts[kw] = term if parts[kw] is None else parts[kw] + term

        acc = parts[P]                  # center column: no shift needed
        for kw in range(K):
            if kw != P:
                acc = acc + shift_w(parts[kw], kw - P)

        pointwise_and_store(acc, pw_ref, b_ref, o_ref)

    return kernel


# ---------------------------------------------------------------------------
# Wrapper
# ---------------------------------------------------------------------------
def dsconv2d_pallas(x_nchw, dw_w, dw_b, pw_w, pw_b, *, block_h=None,
                    use_bf16_matmul=None):
    """DSConv2d forward: depthwise KxK ('same', groups=C) then pointwise 1x1.

    x_nchw: (N, C, H, W);  dw_w: (C, 1, K, K);  dw_b: (C,)
    pw_w:   (O, C, 1, 1);  pw_b: (O,)          -> returns (N, O, H, W)
    """
    N, C, H, W = x_nchw.shape
    O = pw_w.shape[0]
    K = dw_w.shape[-1]
    assert K % 2 == 1, "odd kernel size needed (matches the PyTorch module)"
    P = K // 2

    # Channels-last view; NO channel padding and NO dtype change in HBM.
    # TODO(synk): in an NHWC end-to-end model these two transposes disappear.
    x = jnp.transpose(x_nchw, (0, 2, 3, 1))                              # (N,H,W,C)
    dww = jnp.transpose(dw_w[:, 0, :, :], (1, 2, 0)).astype(jnp.float32)  # (K,K,C)
    pww = jnp.transpose(pw_w[:, :, 0, 0], (1, 0)).astype(jnp.float32)     # (C,O)
    # Fold the depthwise bias through the (linear) pointwise conv.
    b_fused = (pw_w[:, :, 0, 0].astype(jnp.float32) @ dw_b.astype(jnp.float32)
               + pw_b.astype(jnp.float32)).reshape(1, O)

    use_mxu = C >= 32                          # MXU only pays off with enough lanes
    if use_bf16_matmul is None:                # bf16 MXU operands (v6e/v7x lever);
        use_bf16_matmul = C >= 128 and O >= 128  # keep exact f32 for small nets
    mxu_dtype = jnp.bfloat16 if (use_mxu and use_bf16_matmul) else None

    in_bytes = jnp.dtype(x.dtype).itemsize
    if block_h is None:
        block_h = _pick_block_h(H, W, C, O, K, in_bytes, N)
    TH = block_h
    assert H % TH == 0, "block_h must divide H"
    if P > 0:
        assert TH % P == 0, "block_h must be a multiple of kernel_size // 2"
    nH = H // TH

    x_spec = pl.BlockSpec((1, TH, W, C), lambda n, t: (n, t, 0, 0))
    dw_spec = pl.BlockSpec((K, K, C), lambda n, t: (0, 0, 0))
    pw_spec = pl.BlockSpec((C, O), lambda n, t: (0, 0))
    b_spec = pl.BlockSpec((1, O), lambda n, t: (0, 0))

    if P > 0:
        tb = TH // P                   # P-row halo blocks per row tile
        n_hb = H // P                  # P-row blocks along H
        top_spec = pl.BlockSpec(
            (1, P, W, C), lambda n, t: (n, jnp.maximum(t * tb - 1, 0), 0, 0))
        bot_spec = pl.BlockSpec(
            (1, P, W, C), lambda n, t: (n, jnp.minimum((t + 1) * tb, n_hb - 1), 0, 0))
        in_specs = [x_spec, top_spec, bot_spec, dw_spec, pw_spec, b_spec]
        args = (x, x, x, dww, pww, b_fused)
    else:                              # 1x1 depthwise: skip the halo DMAs entirely
        in_specs = [x_spec, dw_spec, pw_spec, b_spec]
        args = (x, dww, pww, b_fused)

    cap, budget = _vmem_caps()
    vmem_limit = int(min(max(budget,
                             _vmem_estimate(TH, W, C, O, K, in_bytes) + (4 << 20)),
                         int(cap * 0.9)))

    flops = 2 * N * H * W * C * (K * K + O)
    bytes_accessed = in_bytes * N * H * W * (C + O) + 4 * (K * K * C + C * O + O)

    out_nhwo = pl.pallas_call(
        _make_kernel(TH, W, C, O, K, use_mxu, mxu_dtype),
        out_shape=jax.ShapeDtypeStruct((N, H, W, O), x.dtype),
        grid_spec=pltpu.PrefetchScalarGridSpec(
            num_scalar_prefetch=0,
            grid=(N, nH),
            in_specs=in_specs,
            out_specs=pl.BlockSpec((1, TH, W, O), lambda n, t: (n, t, 0, 0)),
        ),
        compiler_params=pltpu.CompilerParams(
            dimension_semantics=("parallel", "parallel"),
            vmem_limit_bytes=vmem_limit),
        cost_estimate=pl.CostEstimate(flops=flops, transcendentals=0,
                                      bytes_accessed=bytes_accessed),
    )(*args)

    return jnp.transpose(out_nhwo, (0, 3, 1, 2))


# ---------------------------------------------------------------------------
# Pure-JAX reference matching PyTorch Conv2d semantics
# ---------------------------------------------------------------------------
def _reference(x_nchw, dw_w, dw_b, pw_w, pw_b):
    C = x_nchw.shape[1]
    K = dw_w.shape[-1]
    P = K // 2
    dn = lax.conv_dimension_numbers(x_nchw.shape, dw_w.shape,
                                    ('NCHW', 'OIHW', 'NCHW'))
    out = lax.conv_general_dilated(x_nchw, dw_w, (1, 1), ((P, P), (P, P)),
                                   dimension_numbers=dn, feature_group_count=C)
    out = out + dw_b[None, :, None, None]
    dn2 = lax.conv_dimension_numbers(out.shape, pw_w.shape,
                                     ('NCHW', 'OIHW', 'NCHW'))
    out2 = lax.conv_general_dilated(out, pw_w, (1, 1), ((0, 0), (0, 0)),
                                    dimension_numbers=dn2)
    return out2 + pw_b[None, :, None, None]


if __name__ == "__main__":
    N, Cin, Cout, H, W, K = 2, 4, 8, 16, 16, 3

    key = jax.random.PRNGKey(0)
    k_x, k_dw, k_db, k_pw, k_pb = jax.random.split(key, 5)

    x = jax.random.normal(k_x, (N, Cin, H, W), dtype=jnp.float32)
    dw_w = jax.random.normal(k_dw, (Cin, 1, K, K), dtype=jnp.float32) * 0.1
    dw_b = jax.random.normal(k_db, (Cin,), dtype=jnp.float32) * 0.1
    pw_w = jax.random.normal(k_pw, (Cout, Cin, 1, 1), dtype=jnp.float32) * 0.1
    pw_b = jax.random.normal(k_pb, (Cout,), dtype=jnp.float32) * 0.1

    ref = _reference(x, dw_w, dw_b, pw_w, pw_b)

    # Row-tiled path (grid=(2, 2), exercises halo handling) and the auto-picked
    # single-tile-per-image path.
    for bh in (8, None):
        out = jax.block_until_ready(
            dsconv2d_pallas(x, dw_w, dw_b, pw_w, pw_b, block_h=bh))
        assert out.shape == (N, Cout, H, W)
        assert jnp.allclose(out, ref, atol=1e-4, rtol=1e-4), f"mismatch (block_h={bh})"

    print("KERNEL_OK")
</pallas_src>

<mosaic_0001>
module attributes {stable_mosaic.version = 11 : i64} {
  func.func @kernel(%arg0: i32, %arg1: i32, %arg2: memref<1x8x16x4xf32, #tpu.memory_space<vmem>>, %arg3: memref<1x1x16x4xf32, #tpu.memory_space<vmem>>, %arg4: memref<1x1x16x4xf32, #tpu.memory_space<vmem>>, %arg5: memref<3x3x4xf32, #tpu.memory_space<vmem>>, %arg6: memref<4x8xf32, #tpu.memory_space<vmem>>, %arg7: memref<1x8xf32, #tpu.memory_space<vmem>>, %arg8: memref<1x8x16x8xf32, #tpu.memory_space<vmem>>) attributes {dimension_semantics = [#tpu.dimension_semantics<parallel>, #tpu.dimension_semantics<parallel>], iteration_bounds = array<i64: 2, 2>, scalar_prefetch = 0 : i64, scratch_operands = 0 : i64, tpu.core_type = #tpu.core_type<tc>, window_params = [{transform_indices = @transform_0, window_bounds = array<i64: 1, 8, 16, 4>}, {transform_indices = @transform_1, window_bounds = array<i64: 1, 1, 16, 4>}, {transform_indices = @transform_2, window_bounds = array<i64: 1, 1, 16, 4>}, {pipeline_mode = #tpu.pipeline_mode<synchronous>, transform_indices = @transform_3, window_bounds = array<i64: 3, 3, 4>}, {pipeline_mode = #tpu.pipeline_mode<synchronous>, transform_indices = @transform_4, window_bounds = array<i64: 4, 8>}, {pipeline_mode = #tpu.pipeline_mode<synchronous>, transform_indices = @transform_5, window_bounds = array<i64: 1, 8>}, {transform_indices = @transform_6, window_bounds = array<i64: 1, 8, 16, 8>}]} {
    %c0 = arith.constant 0 : index
    %c0_0 = arith.constant 0 : index
    %c0_1 = arith.constant 0 : index
    %c0_2 = arith.constant 0 : index
    %0 = vector.load %arg2[%c0, %c0_0, %c0_1, %c0_2] : memref<1x8x16x4xf32, #tpu.memory_space<vmem>>, vector<1x8x16x4xf32>
    %1 = vector.shape_cast %0 : vector<1x8x16x4xf32> to vector<8x16x4xf32>
    %c0_i32 = arith.constant 0 : i32
    %2 = arith.cmpi sgt, %arg1, %c0_i32 : i32
    %c0_3 = arith.constant 0 : index
    %c0_4 = arith.constant 0 : index
    %c0_5 = arith.constant 0 : index
    %c0_6 = arith.constant 0 : index
    %3 = vector.load %arg3[%c0_3, %c0_4, %c0_5, %c0_6] : memref<1x1x16x4xf32, #tpu.memory_space<vmem>>, vector<1x1x16x4xf32>
    %4 = vector.shape_cast %3 : vector<1x1x16x4xf32> to vector<1x16x4xf32>
    %cst = arith.constant 0.000000e+00 : f32
    %5 = vector.broadcast %cst : f32 to vector<1x16x4xf32>
    %6 = arith.select %2, %4, %5 : vector<1x16x4xf32>
    %c1_i32 = arith.constant 1 : i32
    %7 = arith.cmpi slt, %arg1, %c1_i32 : i32
    %c0_7 = arith.constant 0 : index
    %c0_8 = arith.constant 0 : index
    %c0_9 = arith.constant 0 : index
    %c0_10 = arith.constant 0 : index
    %8 = vector.load %arg4[%c0_7, %c0_8, %c0_9, %c0_10] : memref<1x1x16x4xf32, #tpu.memory_space<vmem>>, vector<1x1x16x4xf32>
    %9 = vector.shape_cast %8 : vector<1x1x16x4xf32> to vector<1x16x4xf32>
    %cst_11 = arith.constant 0.000000e+00 : f32
    %10 = vector.broadcast %cst_11 : f32 to vector<1x16x4xf32>
    %11 = arith.select %7, %9, %10 : vector<1x16x4xf32>
    %12 = vector.extract_strided_slice %1 {offsets = [0, 0, 0], sizes = [7, 16, 4], strides = [1, 1, 1]} : vector<8x16x4xf32> to vector<7x16x4xf32>
    %13 = tpu.concatenate %6, %12 in 0 : vector<1x16x4xf32>, vector<7x16x4xf32> -> vector<8x16x4xf32>
    %c0_12 = arith.constant 0 : index
    %c0_13 = arith.constant 0 : index
    %c0_14 = arith.constant 0 : index
    %14 = vector.load %arg5[%c0_12, %c0_13, %c0_14] : memref<3x3x4xf32, #tpu.memory_space<vmem>>, vector<1x1x4xf32>
    %15 = vector.shape_cast %14 : vector<1x1x4xf32> to vector<1x4xf32>
    %16 = vector.shape_cast %15 : vector<1x4xf32> to vector<1x1x4xf32>
    %17 = vector.broadcast %16 : vector<1x1x4xf32> to vector<8x16x4xf32>
    %18 = arith.mulf %13, %17 : vector<8x16x4xf32>
    %c0_15 = arith.constant 0 : index
    %c1 = arith.constant 1 : index
    %c0_16 = arith.constant 0 : index
    %19 = vector.load %arg5[%c0_15, %c1, %c0_16] : memref<3x3x4xf32, #tpu.memory_space<vmem>>, vector<1x1x4xf32>
    %20 = vector.shape_cast %19 : vector<1x1x4xf32> to vector<1x4xf32>
    %21 = vector.shape_cast %20 : vector<1x4xf32> to vector<1x1x4xf32>
    %22 = vector.broadcast %21 : vector<1x1x4xf32> to vector<8x16x4xf32>
    %23 = arith.mulf %13, %22 : vector<8x16x4xf32>
    %c0_17 = arith.constant 0 : index
    %c2 = arith.constant 2 : index
    %c0_18 = arith.constant 0 : index
    %24 = vector.load %arg5[%c0_17, %c2, %c0_18] : memref<3x3x4xf32, #tpu.memory_space<vmem>>, vector<1x1x4xf32>
    %25 = vector.shape_cast %24 : vector<1x1x4xf32> to vector<1x4xf32>
    %26 = vector.shape_cast %25 : vector<1x4xf32> to vector<1x1x4xf32>
    %27 = vector.broadcast %26 : vector<1x1x4xf32> to vector<8x16x4xf32>
    %28 = arith.mulf %13, %27 : vector<8x16x4xf32>
    %c1_19 = arith.constant 1 : index
    %c0_20 = arith.constant 0 : index
    %c0_21 = arith.constant 0 : index
    %29 = vector.load %arg5[%c1_19, %c0_20, %c0_21] : memref<3x3x4xf32, #tpu.memory_space<vmem>>, vector<1x1x4xf32>
    %30 = vector.shape_cast %29 : vector<1x1x4xf32> to vector<1x4xf32>
    %31 = vector.shape_cast %30 : vector<1x4xf32> to vector<1x1x4xf32>
    %32 = vector.broadcast %31 : vector<1x1x4xf32> to vector<8x16x4xf32>
    %33 = arith.mulf %1, %32 : vector<8x16x4xf32>
    %34 = arith.addf %18, %33 : vector<8x16x4xf32>
    %c1_22 = arith.constant 1 : index
    %c1_23 = arith.constant 1 : index
    %c0_24 = arith.constant 0 : index
    %35 = vector.load %arg5[%c1_22, %c1_23, %c0_24] : memref<3x3x4xf32, #tpu.memory_space<vmem>>, vector<1x1x4xf32>
    %36 = vector.shape_cast %35 : vector<1x1x4xf32> to vector<1x4xf32>
    %37 = vector.shape_cast %36 : vector<1x4xf32> to vector<1x1x4xf32>
    %38 = vector.broadcast %37 : vector<1x1x4xf32> to vector<8x16x4xf32>
    %39 = arith.mulf %1, %38 : vector<8x16x4xf32>
    %40 = arith.addf %23, %39 : vector<8x16x4xf32>
    %c1_25 = arith.constant 1 : index
    %c2_26 = arith.constant 2 : index
    %c0_27 = arith.constant 0 : index
    %41 = vector.load %arg5[%c1_25, %c2_26, %c0_27] : memref<3x3x4xf32, #tpu.memory_space<vmem>>, vector<1x1x4xf32>
    %42 = vector.shape_cast %41 : vector<1x1x4xf32> to vector<1x4xf32>
    %43 = vector.shape_cast %42 : vector<1x4xf32> to vector<1x1x4xf32>
    %44 = vector.broadcast %43 : vector<1x1x4xf32> to vector<8x16x4xf32>
    %45 = arith.mulf %1, %44 : vector<8x16x4xf32>
    %46 = arith.addf %28, %45 : vector<8x16x4xf32>
    %47 = vector.extract_strided_slice %1 {offsets = [1, 0, 0], sizes = [7, 16, 4], strides = [1, 1, 1]} : vector<8x16x4xf32> to vector<7x16x4xf32>
    %48 = tpu.concatenate %47, %11 in 0 : vector<7x16x4xf32>, vector<1x16x4xf32> -> vector<8x16x4xf32>
    %c2_28 = arith.constant 2 : index
    %c0_29 = arith.constant 0 : index
    %c0_30 = arith.constant 0 : index
    %49 = vector.load %arg5[%c2_28, %c0_29, %c0_30] : memref<3x3x4xf32, #tpu.memory_space<vmem>>, vector<1x1x4xf32>
    %50 = vector.shape_cast %49 : vector<1x1x4xf32> to vector<1x4xf32>
    %51 = vector.shape_cast %50 : vector<1x4xf32> to vector<1x1x4xf32>
    %52 = vector.broadcast %51 : vector<1x1x4xf32> to vector<8x16x4xf32>
    %53 = arith.mulf %48, %52 : vector<8x16x4xf32>
    %54 = arith.addf %34, %53 : vector<8x16x4xf32>
    %c2_31 = arith.constant 2 : index
    %c1_32 = arith.constant 1 : index
    %c0_33 = arith.constant 0 : index
    %55 = vector.load %arg5[%c2_31, %c1_32, %c0_33] : memref<3x3x4xf32, #tpu.memory_space<vmem>>, vector<1x1x4xf32>
    %56 = vector.shape_cast %55 : vector<1x1x4xf32> to vector<1x4xf32>
    %57 = vector.shape_cast %56 : vector<1x4xf32> to vector<1x1x4xf32>
    %58 = vector.broadcast %57 : vector<1x1x4xf32> to vector<8x16x4xf32>
    %59 = arith.mulf %48, %58 : vector<8x16x4xf32>
    %60 = arith.addf %40, %59 : vector<8x16x4xf32>
    %c2_34 = arith.constant 2 : index
    %c2_35 = arith.constant 2 : index
    %c0_36 = arith.constant 0 : index
    %61 = vector.load %arg5[%c2_34, %c2_35, %c0_36] : memref<3x3x4xf32, #tpu.memory_space<vmem>>, vector<1x1x4xf32>
    %62 = vector.shape_cast %61 : vector<1x1x4xf32> to vector<1x4xf32>
    %63 = vector.shape_cast %62 : vector<1x4xf32> to vector<1x1x4xf32>
    %64 = vector.broadcast %63 : vector<1x1x4xf32> to vector<8x16x4xf32>
    %65 = arith.mulf %48, %64 : vector<8x16x4xf32>
    %66 = arith.addf %46, %65 : vector<8x16x4xf32>
    %cst_37 = arith.constant 0.000000e+00 : f32
    %67 = vector.broadcast %cst_37 : f32 to vector<8x1x4xf32>
    %68 = vector.extract_strided_slice %54 {offsets = [0, 0, 0], sizes = [8, 15, 4], strides = [1, 1, 1]} : vector<8x16x4xf32> to vector<8x15x4xf32>
    %69 = tpu.concatenate %67, %68 in 1 : vector<8x1x4xf32>, vector<8x15x4xf32> -> vector<8x16x4xf32>
    %70 = arith.addf %60, %69 : vector<8x16x4xf32>
    %cst_38 = arith.constant 0.000000e+00 : f32
    %71 = vector.broadcast %cst_38 : f32 to vector<8x1x4xf32>
    %72 = vector.extract_strided_slice %66 {offsets = [0, 1, 0], sizes = [8, 15, 4], strides = [1, 1, 1]} : vector<8x16x4xf32> to vector<8x15x4xf32>
    %73 = tpu.concatenate %72, %71 in 1 : vector<8x15x4xf32>, vector<8x1x4xf32> -> vector<8x16x4xf32>
    %74 = arith.addf %70, %73 : vector<8x16x4xf32>
    %c0_39 = arith.constant 0 : index
    %c0_40 = arith.constant 0 : index
    %75 = vector.load %arg7[%c0_39, %c0_40] : memref<1x8xf32, #tpu.memory_space<vmem>>, vector<1x8xf32>
    %76 = vector.extract_strided_slice %74 {offsets = [0, 0, 0], sizes = [8, 16, 1], strides = [1, 1, 1]} : vector<8x16x4xf32> to vector<8x16x1xf32>
    %c0_41 = arith.constant 0 : index
    %c0_42 = arith.constant 0 : index
    %77 = vector.load %arg6[%c0_41, %c0_42] : memref<4x8xf32, #tpu.memory_space<vmem>>, vector<1x8xf32>
    %78 = vector.shape_cast %77 : vector<1x8xf32> to vector<1x1x8xf32>
    %79 = vector.broadcast %76 : vector<8x16x1xf32> to vector<8x16x8xf32>
    %80 = vector.broadcast %78 : vector<1x1x8xf32> to vector<8x16x8xf32>
    %81 = arith.mulf %79, %80 : vector<8x16x8xf32>
    %82 = vector.extract_strided_slice %74 {offsets = [0, 0, 1], sizes = [8, 16, 1], strides = [1, 1, 1]} : vector<8x16x4xf32> to vector<8x16x1xf32>
    %c1_43 = arith.constant 1 : index
    %c0_44 = arith.constant 0 : index
    %83 = vector.load %arg6[%c1_43, %c0_44] : memref<4x8xf32, #tpu.memory_space<vmem>>, vector<1x8xf32>
    %84 = vector.shape_cast %83 : vector<1x8xf32> to vector<1x1x8xf32>
    %85 = vector.broadcast %82 : vector<8x16x1xf32> to vector<8x16x8xf32>
    %86 = vector.broadcast %84 : vector<1x1x8xf32> to vector<8x16x8xf32>
    %87 = arith.mulf %85, %86 : vector<8x16x8xf32>
    %88 = arith.addf %81, %87 : vector<8x16x8xf32>
    %89 = vector.extract_strided_slice %74 {offsets = [0, 0, 2], sizes = [8, 16, 1], strides = [1, 1, 1]} : vector<8x16x4xf32> to vector<8x16x1xf32>
    %c2_45 = arith.constant 2 : index
    %c0_46 = arith.constant 0 : index
    %90 = vector.load %arg6[%c2_45, %c0_46] : memref<4x8xf32, #tpu.memory_space<vmem>>, vector<1x8xf32>
    %91 = vector.shape_cast %90 : vector<1x8xf32> to vector<1x1x8xf32>
    %92 = vector.broadcast %89 : vector<8x16x1xf32> to vector<8x16x8xf32>
    %93 = vector.broadcast %91 : vector<1x1x8xf32> to vector<8x16x8xf32>
    %94 = arith.mulf %92, %93 : vector<8x16x8xf32>
    %95 = arith.addf %88, %94 : vector<8x16x8xf32>
    %96 = vector.extract_strided_slice %74 {offsets = [0, 0, 3], sizes = [8, 16, 1], strides = [1, 1, 1]} : vector<8x16x4xf32> to vector<8x16x1xf32>
    %c3 = arith.constant 3 : index
    %c0_47 = arith.constant 0 : index
    %97 = vector.load %arg6[%c3, %c0_47] : memref<4x8xf32, #tpu.memory_space<vmem>>, vector<1x8xf32>
    %98 = vector.shape_cast %97 : vector<1x8xf32> to vector<1x1x8xf32>
    %99 = vector.broadcast %96 : vector<8x16x1xf32> to vector<8x16x8xf32>
    %100 = vector.broadcast %98 : vector<1x1x8xf32> to vector<8x16x8xf32>
    %101 = arith.mulf %99, %100 : vector<8x16x8xf32>
    %102 = arith.addf %95, %101 : vector<8x16x8xf32>
    %103 = vector.shape_cast %75 : vector<1x8xf32> to vector<1x1x8xf32>
    %104 = vector.broadcast %103 : vector<1x1x8xf32> to vector<8x16x8xf32>
    %105 = arith.addf %102, %104 : vector<8x16x8xf32>
    %c0_48 = arith.constant 0 : index
    %c0_49 = arith.constant 0 : index
    %c0_50 = arith.constant 0 : index
    %c0_51 = arith.constant 0 : index
    %106 = vector.load %arg8[%c0_48, %c0_49, %c0_50, %c0_51] : memref<1x8x16x8xf32, #tpu.memory_space<vmem>>, vector<1x8x16x8xf32>
    %107 = vector.shape_cast %106 : vector<1x8x16x8xf32> to vector<8x16x8xf32>
    %108 = vector.shape_cast %105 : vector<8x16x8xf32> to vector<1x8x16x8xf32>
    tpu.vector_store %arg8[%c0_48, %c0_49, %c0_50, %c0_51], %108 {strides = array<i32>} : memref<1x8x16x8xf32, #tpu.memory_space<vmem>>, vector<1x8x16x8xf32>,
    return
  }
  func.func @transform_0(%arg0: i32, %arg1: i32) -> (i32, i32, i32, i32) {
    %c0_i32 = arith.constant 0 : i32
    %c0_i32_0 = arith.constant 0 : i32
    %c0_i32_1 = arith.constant 0 : i32
    return %arg0, %arg1, %c0_i32, %c0_i32_0 : i32, i32, i32, i32
  }
  func.func @transform_1(%arg0: i32, %arg1: i32) -> (i32, i32, i32, i32) {
    %c8_i32 = arith.constant 8 : i32
    %0 = arith.muli %arg1, %c8_i32 : i32
    %c1_i32 = arith.constant 1 : i32
    %1 = arith.subi %0, %c1_i32 : i32
    %c0_i32 = arith.constant 0 : i32
    %2 = arith.maxsi %1, %c0_i32 : i32
    %c0_i32_0 = arith.constant 0 : i32
    %c0_i32_1 = arith.constant 0 : i32
    %c0_i32_2 = arith.constant 0 : i32
    return %arg0, %2, %c0_i32_0, %c0_i32_1 : i32, i32, i32, i32
  }
  func.func @transform_2(%arg0: i32, %arg1: i32) -> (i32, i32, i32, i32) {
    %c1_i32 = arith.constant 1 : i32
    %0 = arith.addi %arg1, %c1_i32 : i32
    %c8_i32 = arith.constant 8 : i32
    %1 = arith.muli %0, %c8_i32 : i32
    %c15_i32 = arith.constant 15 : i32
    %2 = arith.minsi %1, %c15_i32 : i32
    %c0_i32 = arith.constant 0 : i32
    %c0_i32_0 = arith.constant 0 : i32
    %c0_i32_1 = arith.constant 0 : i32
    return %arg0, %2, %c0_i32, %c0_i32_0 : i32, i32, i32, i32
  }
  func.func @transform_3(%arg0: i32, %arg1: i32) -> (i32, i32, i32) {
    %c0_i32 = arith.constant 0 : i32
    %c0_i32_0 = arith.constant 0 : i32
    %c0_i32_1 = arith.constant 0 : i32
    %c0_i32_2 = arith.constant 0 : i32
    return %c0_i32, %c0_i32_0, %c0_i32_1 : i32, i32, i32
  }
  func.func @transform_4(%arg0: i32, %arg1: i32) -> (i32, i32) {
    %c0_i32 = arith.constant 0 : i32
    %c0_i32_0 = arith.constant 0 : i32
    %c0_i32_1 = arith.constant 0 : i32
    return %c0_i32, %c0_i32_0 : i32, i32
  }
  func.func @transform_5(%arg0: i32, %arg1: i32) -> (i32, i32) {
    %c0_i32 = arith.constant 0 : i32
    %c0_i32_0 = arith.constant 0 : i32
    %c0_i32_1 = arith.constant 0 : i32
    return %c0_i32, %c0_i32_0 : i32, i32
  }
  func.func @transform_6(%arg0: i32, %arg1: i32) -> (i32, i32, i32, i32) {
    %c0_i32 = arith.constant 0 : i32
    %c0_i32_0 = arith.constant 0 : i32
    %c0_i32_1 = arith.constant 0 : i32
    return %arg0, %arg1, %c0_i32, %c0_i32_0 : i32, i32, i32, i32
  }
}

</mosaic_0001>

<bundles_post_ra>
// kernel: tpu_custom_call.1
= control target key start
LH: loop header
LB: loop body
LE: loop exit
PB: predicated region body
PF: predicated region fallthrough
CT: control target
= control target key end

     0   :  { %s1695_s21 = smov 0   ;;  %s1697_s22 = smov 0   ;;  %s2606_s0 = inlined_call_operand.vmem [shape: f32[2,16,16,4], index: 0, kind: input, shape index: {}]   ;;  %s2607_s1 = inlined_call_operand.vmem [shape: f32[2,16,16,4], index: 1, kind: input, shape index: {}]   ;;  %s2608_s2 = inlined_call_operand.vmem [shape: f32[2,16,16,4], index: 2, kind: input, shape index: {}]   ;;  %s2609_s3 = inlined_call_operand.vmem [shape: f32[3,3,4], index: 3, kind: input, shape index: {}]   ;;  %s2610_s4 = inlined_call_operand.vmem [shape: f32[4,8], index: 4, kind: input, shape index: {}]   ;;  %s2611_s5 = inlined_call_operand.vmem [shape: f32[1,8], index: 5, kind: input, shape index: {}]   ;;  %s2612_s6 = inlined_call_operand.vmem [shape: f32[2,16,16,8], index: 6, kind: output, shape index: {}]  }
   0x1   :  { %s1699_s23 = smov 0   ;;  %s1701_s24 = smov 0  }
   0x2   :  { %s1703_s25 = smov 0  }
   0x3 LB: > { %s25_s26 = sadd.s32 1, %s1646_s23  ;;  %s28_s27 = sadd.s32 1, %s1650_s24  ;;  %s1654_s25 = sphi %s1703_s25, %s16_s25   ;;  %s1650_s24 = sphi %s1701_s24, %s2617_s24   ;;  %s1646_s23 = sphi %s1699_s23, %s2616_s23   ;;  %s1642_s22 = sphi %s1697_s22, %s2615_s22   ;;  %s1638_s21 = sphi %s1695_s21, %s2614_s21  }
   0x4   : > { %p26_p0 = scmp.ge.s32.totalorder %s25_s26, 2  ;;  %p1496_p1 = scmp.ge.s32.totalorder %s1654_s25, 1 }
   0x5   : > { %p298_p2 = scmp.lt.s32.totalorder %s1654_s25, 5 }
   0x6   : > { %s2619_s26 = smov (%p26_p0, %s25_s26), 0  ;;  %s2621_s27 = smov (!%p26_p0, %s28_s27), %s1650_s24 }
   0x7   : > { %p299_p3 = pnand %p1496_p1, %p298_p2  ;;  %p30_p4 = scmp.ge.s32.totalorder %s2621_s27, 2 }
   0x8   : > { %s1728_s28 = sshll.u32 (!%p299_p3), %s1638_s21, 3  ;;  %p365_p5 = scmp.lt.s32.totalorder (!%p299_p3), %s1642_s22, 1 }
   0x9   : > { %s2623_s27 = smov (%p30_p4, %s2621_s27), 0  ;;  %302 = sbr.rel (%p299_p3) target bundleno = 347 (0x15b), region = 44 }
   0xa   : > { %p367_p6 = scmp.lt.s32.totalorder (!%p299_p3), %s1728_s28, 15  ;;  %s1551_s16 = sadd.s32 (!%p299_p3), 8, %s1728_s28 }
   0xb   : > { %p1848_p7 = scmp.lt.s32.totalorder (!%p299_p3), %s1551_s16, 15  ;;  %p436_p10 = scmp.gt.s32.totalorder (!%p299_p3), %s1638_s21, 0 }
   0xc   : > { %p444_p11 = scmp.lt.s32.totalorder (!%p299_p3), %s1638_s21, 1 }
   0xe   : > { %v1656_v0 = vmov 0   ;;  %s2625_s22 = smov (!%p365_p5, %s1642_s22), 1  ;;  %v1737_v1 = vld [vmem:[%s2609_s3] ss:$0 sm:$0xff]  ;;  %v1745_v2 = vld [vmem:[%s2609_s3 + $0x1] ss:$0 sm:$0xff] }
   0xf   : > { %1597 = vset.pattern.permute.xlu0 %v1656_v0  ;;  %1596 = vset.pattern.permute.xlu1 %v1656_v0  ;;  %s368_s29 = scalar_select %p367_p6, %s1728_s28, 15  ;;  %v1750_v3 = vld [vmem:[%s2609_s3 + $0x2] ss:$0 sm:$0xff]  ;;  %v1755_v4 = vld [vmem:[%s2609_s3 + $0x4] ss:$0 sm:$0xff]  ;;  %vm755_vm0 = vcmask 1040384  }
  0x10   : > { %s1732_s30 = sshll.u32 %s2625_s22, 5  ;;  %v1761_v5 = vld [vmem:[%s2609_s3 + $0x5] ss:$0 sm:$0xff]  ;;  %v1766_v6 = vld [vmem:[%s2609_s3 + $0x6] ss:$0 sm:$0xff]  ;;  %vm836_vm1 = vcmask 1046528  }
  0x11   : > { %s1498_s7 = sshll.u32 %s368_s29, 1  ;;  %v1778_v7 = vld [vmem:[%s2609_s3 + $0x8] ss:$0 sm:$0xff]  ;;  %v1783_v8 = vld [vmem:[%s2609_s3 + $0x9] ss:$0 sm:$0xff]  ;;  %s2627_s16 = smov (!%p1848_p7, %s1551_s16), 15 }
  0x12   : > { %s1740_s10 = sadd.s32 %s1732_s30, %s1498_s7  ;;  %v1788_v9 = vld [vmem:[%s2609_s3 + $0xa] ss:$0 sm:$0xff]  ;;  %s2629_s16 = smov (!%p1848_p7, %s2627_s16), 15  ;;  %vm1328_vm2 = vcmask 64512  }
  0x13   : > { %s1500_s17 = sshll.u32 %s1740_s10, 3  ;;  %s1898_s19 = sshll.u32 %s2629_s16, 1 }
  0x14   : > { %s1773_s8 = scalar_lea.vmem %s2606_s0, %s1500_s17  ;;  %s402_s20 = sadd.s32 %s1898_s19, %s1732_s30 }
  0x15   : > { %v1791_v10 = vld [vmem:[%s1773_s8 + $0x10] sm:$0xff]  ;;  %v1794_v11 = vld [vmem:[%s1773_s8 + $0x18] sm:$0xff]  ;;  %v424_v12 = vld [vmem:[%s1773_s8 + $0x20] sm:$0xff]  ;;  %s1962_s22 = sadd.s32 4294967295, %s1728_s28  ;;  %s1517_s14 = sshll.u32 %s402_s20, 3 }
  0x16   : > { %v1798_v13 = vld [vmem:[%s1773_s8 + $0x28] sm:$0xff]  ;;  %v1801_v14 = vld [vmem:[%s1773_s8 + $0x30] sm:$0xff]  ;;  %v1804_v15 = vld [vmem:[%s1773_s8 + $0x38] sm:$0xff]  ;;  %v461_v16 = vmul.f32 %v1737_v1, %v1791_v10  ;;  %v482_v17 = vmul.f32 %v1745_v2, %v1791_v10  ;;  %v503_v18 = vmul.f32 %v1750_v3, %v1791_v10  ;;  %v504_v19 = vmul.f32 %v1750_v3, %v1794_v11  ;;  %p377_p8 = scmp.gt.s32.totalorder %s1962_s22, 0  ;;  %p1503_p9 = scmp.lt.s32.totalorder %s1962_s22, 15 }
  0x17   : > { %v525_v20 = vmul.f32 %v1755_v4, %v424_v12  ;;  %v562_v21 = vmul.f32 %v1761_v5, %v424_v12  ;;  %v599_v22 = vmul.f32 %v1766_v6, %v424_v12  ;;  %v600_v23 = vmul.f32 %v1766_v6, %v1798_v13  ;;  %v1820_v24 = vld [vmem:[%s1773_s8] sm:$0xff]  ;;  %v1823_v25 = vld [vmem:[%s1773_s8 + $0x8] sm:$0xff]  ;;  %s2128_s11 = scalar_select %p436_p10, 255, 0 }
  0x18   : > { %v637_v26 = vmul.f32 %v1778_v7, %v1801_v14  ;;  %v674_v27 = vmul.f32 %v1783_v8, %v1801_v14  ;;  %v711_v28 = vmul.f32 %v1788_v9, %v1801_v14  ;;  %v712_v29 = vmul.f32 %v1788_v9, %v1804_v15  ;;  %v1881_v0 = vld [vmem:[%s1773_s8 + $0x40] sm:$0xff]  ;;  %s378_s28 = scalar_select %p377_p8, %s1962_s22, 0 }
  0x19   : > { %v541_v30 = vadd.f32 %v525_v20, %v461_v16  ;;  %v578_v31 = vadd.f32 %v562_v21, %v482_v17  ;;  %v615_v32 = vadd.f32 %v599_v22, %v503_v18  ;;  %v616_v33 = vadd.f32 %v600_v23, %v504_v19  ;;  %s2244_s15 = scalar_select %p444_p11, 255, 0 }
  0x1a   : > { %v459_v34 = vmul.f32 %v1737_v1, %v1820_v24  ;;  %v480_v35 = vmul.f32 %v1745_v2, %v1820_v24  ;;  %v501_v36 = vmul.f32 %v1750_v3, %v1820_v24  ;;  %v502_v37 = vmul.f32 %v1750_v3, %v1823_v25  ;;  %s2631_s28 = smov (!%p1503_p9, %s378_s28), 15  ;;  %s2259_s16 = scalar_lea.vmem %s2608_s2, %s1517_s14 }
  0x1b   : > { %v1842_v38 = vadd.f32 %v637_v26, %v541_v30  ;;  %v690_v39 = vadd.f32 %v674_v27, %v578_v31  ;;  %v727_v40 = vadd.f32 %v711_v28, %v615_v32  ;;  %v1844_v41 = vadd.f32 %v712_v29, %v616_v33  ;;  %v1905_v29 = vld [vmem:[%s1773_s8 + $0x48] sm:$0xff]  ;;  %s1508_s29 = sshll.u32 %s2631_s28, 1  ;;  %s2475_s14 = scalar_lea.vmem %s2612_s6, %s1500_s17 }
  0x1c   : > { %v523_v42 = vmul.f32 %v1755_v4, %v1791_v10  ;;  %v560_v43 = vmul.f32 %v1761_v5, %v1791_v10  ;;  %v597_v44 = vmul.f32 %v1766_v6, %v1791_v10  ;;  %v598_v45 = vmul.f32 %v1766_v6, %v1794_v11  ;;  %s2085_s7 = sadd.s32 %s1508_s29, %s1732_s30 }
  0x1d   : > { %v762_v46 = vrot.slane %v1842_v38, 7  ;;  %v843_v47 = vrot.slane %v727_v40, 1  ;;  %v844_v48 = vrot.slane %v1844_v41, 1  ;;  %v635_v49 = vmul.f32 %v1778_v7, %v424_v12  ;;  %s1510_s9 = sshll.u32 %s2085_s7, 3 }
  0x1e   : > { %v539_v50 = vadd.f32 %v523_v42, %v459_v34  ;;  %v576_v51 = vadd.f32 %v560_v43, %v480_v35  ;;  %v613_v52 = vadd.f32 %v597_v44, %v501_v36  ;;  %v614_v53 = vadd.f32 %v598_v45, %v502_v37  ;;  %s387_s13 = scalar_lea.vmem %s2607_s1, %s1510_s9 }
  0x1f   : > { %v798_v54 = vsel %vm755_vm0, 0.0, %v762_v46  ;;  %v845_v55 = vsel %vm836_vm1, %v843_v47, %v844_v48  ;;  %v672_v56 = vmul.f32 %v1783_v8, %v424_v12  ;;  %v709_v57 = vmul.f32 %v1788_v9, %v424_v12 }
  0x20   : > { %v808_v58 = vadd.f32 %v798_v54, %v690_v39  ;;  %v1875_v59 = vadd.f32 %v635_v49, %v539_v50  ;;  %v710_v60 = vmul.f32 %v1788_v9, %v1798_v13  ;;  %v463_v61 = vmul.f32 %v1737_v1, %v424_v12 }
  0x21   : > { %v688_v62 = vadd.f32 %v672_v56, %v576_v51  ;;  %v725_v63 = vadd.f32 %v709_v57, %v613_v52  ;;  %v484_v16 = vmul.f32 %v1745_v2, %v424_v12  ;;  %v505_v17 = vmul.f32 %v1750_v3, %v424_v12 }
  0x22   : > { %v1887_v18 = vadd.f32 %v845_v55, %v808_v58  ;;  %v726_v19 = vadd.f32 %v710_v60, %v614_v53  ;;  %v759_v20 = vrot.slane %v1875_v59, 7  ;;  %v506_v21 = vmul.f32 %v1750_v3, %v1798_v13 }
  0x23   : > { %v840_v22 = vrot.slane %v725_v63, 1  ;;  %v527_v23 = vmul.f32 %v1755_v4, %v1801_v14  ;;  %v564_v26 = vmul.f32 %v1761_v5, %v1801_v14  ;;  %v601_v12 = vmul.f32 %v1766_v6, %v1801_v14 }
  0x24   : > { %925 = vperm.xlu0 %1597, %v1887_v18   ;;  %v797_v27 = vsel %vm755_vm0, 0.0, %v759_v20  ;;  %v841_v28 = vrot.slane %v726_v19, 1  ;;  %v602_v30 = vmul.f32 %v1766_v6, %v1804_v15  ;;  %v639_v31 = vmul.f32 %v1778_v7, %v1881_v0 }
  0x25   : > { %v806_v32 = vadd.f32 %v797_v27, %v688_v62  ;;  %v543_v33 = vadd.f32 %v527_v23, %v463_v61  ;;  %v580_v34 = vadd.f32 %v564_v26, %v484_v16  ;;  %v617_v35 = vadd.f32 %v601_v12, %v505_v17 }
  0x26   : > { %v842_v36 = vsel %vm836_vm1, %v840_v22, %v841_v28  ;;  %v618_v37 = vadd.f32 %v602_v30, %v506_v21  ;;  %v676_v39 = vmul.f32 %v1783_v8, %v1881_v0  ;;  %v713_v40 = vmul.f32 %v1788_v9, %v1881_v0  ;;  %v1948_v21 = vld [vmem:[%s1773_s8 + $0x50] sm:$0xff] }
  0x27   : > { %v1918_v42 = vadd.f32 %v842_v36, %v806_v32  ;;  %v1920_v43 = vadd.f32 %v639_v31, %v543_v33  ;;  %v714_v44 = vmul.f32 %v1788_v9, %v1905_v29  ;;  %v460_v45 = vmul.f32 %v1737_v1, %v1823_v25  ;;  %v1967_v32 = vld [vmem:[%s1773_s8 + $0x58] sm:$0xff] }
  0x28   : > { %v692_v47 = vadd.f32 %v676_v39, %v580_v34  ;;  %v729_v49 = vadd.f32 %v713_v40, %v617_v35  ;;  %v481_v50 = vmul.f32 %v1745_v2, %v1823_v25  ;;  %v524_v51 = vmul.f32 %v1755_v4, %v1794_v11 }
  0x29   : > { %915 = vperm.xlu1 %1596, %v1918_v42   ;;  %v1931_v52 = vadd.f32 %v714_v44, %v618_v37  ;;  %v765_v53 = vrot.slane %v1920_v43, 7  ;;  %v561_v54 = vmul.f32 %v1761_v5, %v1794_v11  ;;  %v636_v55 = vmul.f32 %v1778_v7, %v1798_v13 }
  0x2a   : > { %v846_v56 = vrot.slane %v729_v49, 1  ;;  %v540_v57 = vadd.f32 %v524_v51, %v460_v45  ;;  %v673_v58 = vmul.f32 %v1783_v8, %v1798_v13  ;;  %v878_v60 = vsel %vm836_vm1, %v841_v28, 0.0 }
  0x2b   : > { %v799_v61 = vsel %vm755_vm0, 0.0, %v765_v53  ;;  %v847_v62 = vrot.slane %v1931_v52, 1  ;;  %v577_v63 = vadd.f32 %v561_v54, %v481_v50  ;;  %v465_v16 = vmul.f32 %v1737_v1, %v1801_v14 }
  0x2c   : > { %v810_v17 = vadd.f32 %v799_v61, %v692_v47  ;;  %v652_v19 = vadd.f32 %v636_v55, %v540_v57  ;;  %v486_v22 = vmul.f32 %v1745_v2, %v1801_v14  ;;  %v507_v23 = vmul.f32 %v1750_v3, %v1801_v14 }
  0x2d   : > { %v848_v26 = vsel %vm836_vm1, %v846_v56, %v847_v62  ;;  %v689_v12 = vadd.f32 %v673_v58, %v577_v63  ;;  %v508_v27 = vmul.f32 %v1750_v3, %v1804_v15  ;;  %v529_v28 = vmul.f32 %v1755_v4, %v1881_v0 }
  0x2e   : > { %v1964_v30 = vadd.f32 %v848_v26, %v810_v17  ;;  %v760_v31 = vrot.slane %v652_v19, 7  ;;  %v566_v14 = vmul.f32 %v1761_v5, %v1881_v0  ;;  %v603_v33 = vmul.f32 %v1766_v6, %v1881_v0 }
  0x2f   : > { %v545_v34 = vadd.f32 %v529_v28, %v465_v16  ;;  %v604_v35 = vmul.f32 %v1766_v6, %v1905_v29  ;;  %v641_v36 = vmul.f32 %v1778_v7, %v1948_v21  ;;  %v678_v37 = vmul.f32 %v1783_v8, %v1948_v21  ;;  %v2020_v28 = vld [vmem:[%s1773_s8 + $0x60] sm:$0xff] }
  0x30   : > { %935 = vperm.xlu0 %1597, %v1964_v30   ;;  %v761_v39 = vsel %vm755_vm0, %v759_v20, %v760_v31  ;;  %v582_v40 = vadd.f32 %v566_v14, %v486_v22  ;;  %v619_v44 = vadd.f32 %v603_v33, %v507_v23  ;;  %v715_v45 = vmul.f32 %v1788_v9, %v1948_v21 }
  0x31   : > { %v807_v47 = vadd.f32 %v761_v39, %v689_v12  ;;  %v620_v49 = vadd.f32 %v604_v35, %v508_v27  ;;  %v1986_v50 = vadd.f32 %v641_v36, %v545_v34  ;;  %v716_v51 = vmul.f32 %v1788_v9, %v1967_v32 }
  0x32   : > { %v694_v54 = vadd.f32 %v678_v37, %v582_v40  ;;  %v731_v59 = vadd.f32 %v715_v45, %v619_v44  ;;  %v462_v20 = vmul.f32 %v1737_v1, %v1794_v11  ;;  %v483_v55 = vmul.f32 %v1745_v2, %v1794_v11  ;;  %v2037_v37 = vld [vmem:[%s1773_s8 + $0x68] sm:$0xff] }
  0x33   : > { %v1994_v56 = vadd.f32 %v878_v60, %v807_v47  ;;  %v1996_v57 = vadd.f32 %v716_v51, %v620_v49  ;;  %v768_v58 = vrot.slane %v1986_v50, 7  ;;  %v526_v61 = vmul.f32 %v1755_v4, %v1798_v13 }
  0x34   : > { %v849_v63 = vrot.slane %v731_v59, 1  ;;  %v563_v16 = vmul.f32 %v1761_v5, %v1798_v13  ;;  %v638_v17 = vmul.f32 %v1778_v7, %v1804_v15  ;;  %v675_v60 = vmul.f32 %v1783_v8, %v1804_v15 }
  0x35   : > { %920 = vperm.xlu1 %1596, %v1994_v56   ;;  %v800_v19 = vsel %vm755_vm0, 0.0, %v768_v58  ;;  %v850_v22 = vrot.slane %v1996_v57, 1  ;;  %v542_v23 = vadd.f32 %v526_v61, %v462_v20  ;;  %v879_v26 = vsel %vm836_vm1, %v844_v48, 0.0 }
  0x36   : > { %v812_v12 = vadd.f32 %v800_v19, %v694_v54  ;;  %v579_v27 = vadd.f32 %v563_v16, %v483_v55  ;;  %v467_v31 = vmul.f32 %v1737_v1, %v1881_v0  ;;  %v488_v14 = vmul.f32 %v1745_v2, %v1881_v0 }
  0x37   : > { %v851_v33 = vsel %vm836_vm1, %v849_v63, %v850_v22  ;;  %v654_v34 = vadd.f32 %v638_v17, %v542_v23  ;;  %v509_v41 = vmul.f32 %v1750_v3, %v1881_v0  ;;  %v510_v48 = vmul.f32 %v1750_v3, %v1905_v29 }
  0x38   : > { %v2034_v35 = vadd.f32 %v851_v33, %v812_v12  ;;  %v691_v36 = vadd.f32 %v675_v60, %v579_v27  ;;  %v531_v39 = vmul.f32 %v1755_v4, %v1948_v21  ;;  %v568_v40 = vmul.f32 %v1761_v5, %v1948_v21 }
  0x39   : > { %v763_v44 = vrot.slane %v654_v34, 7  ;;  %v605_v0 = vmul.f32 %v1766_v6, %v1948_v21  ;;  %v606_v45 = vmul.f32 %v1766_v6, %v1967_v32  ;;  %v643_v47 = vmul.f32 %v1778_v7, %v2020_v28 }
  0x3a   : > { %945 = vperm.xlu0 %1597, %v2034_v35   ;;  %v547_v49 = vadd.f32 %v531_v39, %v467_v31  ;;  %v584_v51 = vadd.f32 %v568_v40, %v488_v14  ;;  %v680_v54 = vmul.f32 %v1783_v8, %v2020_v28  ;;  %v717_v59 = vmul.f32 %v1788_v9, %v2020_v28 }
  0x3b   : > { %v764_v20 = vsel %vm755_vm0, %v762_v46, %v763_v44  ;;  %v621_v55 = vadd.f32 %v605_v0, %v509_v41  ;;  %v622_v61 = vadd.f32 %v606_v45, %v510_v48  ;;  %v718_v63 = vmul.f32 %v1788_v9, %v2037_v37 }
  0x3c   : > { %v809_v16 = vadd.f32 %v764_v20, %v691_v36  ;;  %v2063_v17 = vadd.f32 %v643_v47, %v547_v49  ;;  %v696_v60 = vadd.f32 %v680_v54, %v584_v51  ;;  %v464_v19 = vmul.f32 %v1737_v1, %v1798_v13  ;;  %v2100_v47 = vld [vmem:[%s1773_s8 + $0x70] sm:$0xff] }
  0x3d   : > { %v733_v23 = vadd.f32 %v717_v59, %v621_v55  ;;  %v2068_v12 = vadd.f32 %v718_v63, %v622_v61  ;;  %v485_v38 = vmul.f32 %v1745_v2, %v1798_v13  ;;  %v528_v46 = vmul.f32 %v1755_v4, %v1804_v15  ;;  %v2114_v55 = vld [vmem:[%s1773_s8 + $0x78] sm:$0xff] }
  0x3e   : > { %v2074_v27 = vadd.f32 %v879_v26, %v809_v16  ;;  %v771_v31 = vrot.slane %v2063_v17, 7  ;;  %v565_v14 = vmul.f32 %v1761_v5, %v1804_v15  ;;  %v640_v33 = vmul.f32 %v1778_v7, %v1905_v29 }
  0x3f   : > { %v852_v34 = vrot.slane %v733_v23, 1  ;;  %v853_v41 = vrot.slane %v2068_v12, 1  ;;  %v544_v48 = vadd.f32 %v528_v46, %v464_v19  ;;  %v677_v13 = vmul.f32 %v1783_v8, %v1905_v29 }
  0x40   : > { %930 = vperm.xlu1 %1596, %v2074_v27   ;;  %v801_v26 = vsel %vm755_vm0, 0.0, %v771_v31  ;;  %v581_v36 = vadd.f32 %v565_v14, %v485_v38  ;;  %v880_v39 = vsel %vm836_vm1, %v847_v62, 0.0  ;;  %v469_v40 = vmul.f32 %v1737_v1, %v1948_v21 }
  0x41   : > { %v814_v44 = vadd.f32 %v801_v26, %v696_v60  ;;  %v854_v0 = vsel %vm836_vm1, %v852_v34, %v853_v41  ;;  %v656_v45 = vadd.f32 %v640_v33, %v544_v48  ;;  %v490_v49 = vmul.f32 %v1745_v2, %v1948_v21 }
  0x42   : > { %v693_v51 = vadd.f32 %v677_v13, %v581_v36  ;;  %v511_v52 = vmul.f32 %v1750_v3, %v1948_v21  ;;  %v512_v62 = vmul.f32 %v1750_v3, %v1967_v32  ;;  %v533_v54 = vmul.f32 %v1755_v4, %v2020_v28 }
  0x43   : > { %v2111_v59 = vadd.f32 %v854_v0, %v814_v44  ;;  %v766_v20 = vrot.slane %v656_v45, 7  ;;  %v570_v61 = vmul.f32 %v1761_v5, %v2020_v28  ;;  %v607_v63 = vmul.f32 %v1766_v6, %v2020_v28 }
  0x44   : > { %v549_v16 = vadd.f32 %v533_v54, %v469_v40  ;;  %v608_v21 = vmul.f32 %v1766_v6, %v2037_v37  ;;  %v645_v60 = vmul.f32 %v1778_v7, %v2100_v47  ;;  %v682_v19 = vmul.f32 %v1783_v8, %v2100_v47 }
  0x45   : > { %955 = vperm.xlu0 %1597, %v2111_v59   ;;  %v767_v23 = vsel %vm755_vm0, %v765_v53, %v766_v20  ;;  %v586_v38 = vadd.f32 %v570_v61, %v490_v49  ;;  %v623_v46 = vadd.f32 %v607_v63, %v511_v52  ;;  %v719_v14 = vmul.f32 %v1788_v9, %v2100_v47  ;;  %v1606_v49 = vld [vmem:[%s387_s13] sm:%s2128_s11]  ;;  %v1609_v63 = vld [vmem:[%s387_s13 + $0x8] sm:%s2128_s11] }
  0x46   : > { %v811_v33 = vadd.f32 %v767_v23, %v693_v51  ;;  %v624_v34 = vadd.f32 %v608_v21, %v512_v62  ;;  %v2139_v48 = vadd.f32 %v645_v60, %v549_v16  ;;  %v720_v13 = vmul.f32 %v1788_v9, %v2114_v55 }
  0x47   : > { %v698_v43 = vadd.f32 %v682_v19, %v586_v38  ;;  %v735_v26 = vadd.f32 %v719_v14, %v623_v46  ;;  %v466_v53 = vmul.f32 %v1737_v1, %v1804_v15  ;;  %v487_v36 = vmul.f32 %v1745_v2, %v1804_v15 }
  0x48   : > { %v2147_v40 = vadd.f32 %v880_v39, %v811_v33  ;;  %v2149_v44 = vadd.f32 %v720_v13, %v624_v34  ;;  %v774_v0 = vrot.slane %v2139_v48, 7  ;;  %v530_v45 = vmul.f32 %v1755_v4, %v1905_v29 }
  0x49   : > { %v855_v51 = vrot.slane %v735_v26, 1  ;;  %v567_v52 = vmul.f32 %v1761_v5, %v1905_v29  ;;  %v642_v62 = vmul.f32 %v1778_v7, %v1967_v32  ;;  %v679_v15 = vmul.f32 %v1783_v8, %v1967_v32 }
  0x4a   : > { %940 = vperm.xlu1 %1596, %v2147_v40   ;;  %v802_v39 = vsel %vm755_vm0, 0.0, %v774_v0  ;;  %v856_v54 = vrot.slane %v2149_v44, 1  ;;  %v546_v20 = vadd.f32 %v530_v45, %v466_v53  ;;  %v881_v61 = vsel %vm836_vm1, %v850_v22, 0.0 }
  0x4b   : > { %v816_v16 = vadd.f32 %v802_v39, %v698_v43  ;;  %v583_v21 = vadd.f32 %v567_v52, %v487_v36  ;;  %v457_v60 = vmul.f32 %v1606_v49, %v1737_v1  ;;  %v478_v38 = vmul.f32 %v1606_v49, %v1745_v2 }
  0x4c   : > { %v857_v19 = vsel %vm836_vm1, %v855_v51, %v856_v54  ;;  %v658_v23 = vadd.f32 %v642_v62, %v546_v20  ;;  %v499_v57 = vmul.f32 %v1606_v49, %v1750_v3  ;;  %v500_v22 = vmul.f32 %v1609_v63, %v1750_v3 }
  0x4d   : > { %v2175_v46 = vadd.f32 %v857_v19, %v816_v16  ;;  %v695_v14 = vadd.f32 %v679_v15, %v583_v21  ;;  %v521_v34 = vmul.f32 %v1755_v4, %v1820_v24  ;;  %v558_v13 = vmul.f32 %v1761_v5, %v1820_v24 }
  0x4e   : > { %v769_v33 = vrot.slane %v658_v23, 7  ;;  %v595_v43 = vmul.f32 %v1766_v6, %v1820_v24  ;;  %v596_v26 = vmul.f32 %v1766_v6, %v1823_v25  ;;  %v633_v53 = vmul.f32 %v1778_v7, %v1791_v10 }
  0x4f   : > { %965 = vperm.xlu0 %1597, %v2175_v46   ;;  %v670_v36 = vmul.f32 %v1783_v8, %v1791_v10  ;;  %v707_v45 = vmul.f32 %v1788_v9, %v1791_v10  ;;  %v537_v24 = vadd.f32 %v521_v34, %v457_v60  ;;  %v574_v51 = vadd.f32 %v558_v13, %v478_v38 }
  0x50   : > { %v770_v49 = vsel %vm755_vm0, %v768_v58, %v769_v33  ;;  %v611_v52 = vadd.f32 %v595_v43, %v499_v57  ;;  %v612_v15 = vadd.f32 %v596_v26, %v500_v22  ;;  %v708_v39 = vmul.f32 %v1788_v9, %v1794_v11 }
  0x51   : > { %v813_v62 = vadd.f32 %v770_v49, %v695_v14  ;;  %v468_v20 = vmul.f32 %v1737_v1, %v1905_v29  ;;  %v649_v16 = vadd.f32 %v633_v53, %v537_v24  ;;  %v686_v21 = vadd.f32 %v670_v36, %v574_v51 }
  0x52   : > { %v723_v19 = vadd.f32 %v707_v45, %v611_v52  ;;  %v489_v10 = vmul.f32 %v1745_v2, %v1905_v29  ;;  %v724_v58 = vadd.f32 %v708_v39, %v612_v15  ;;  %v532_v60 = vmul.f32 %v1755_v4, %v1967_v32 }
  0x53   : > { %v2204_v50 = vadd.f32 %v881_v61, %v813_v62  ;;  %v569_v23 = vmul.f32 %v1761_v5, %v1967_v32  ;;  %v756_v38 = vrot.slane %v649_v16, 7  ;;  %v644_v57 = vmul.f32 %v1778_v7, %v2037_v37 }
  0x54   : > { %v837_v14 = vrot.slane %v723_v19, 1  ;;  %v681_v22 = vmul.f32 %v1783_v8, %v2037_v37  ;;  %v838_v29 = vrot.slane %v724_v58, 1  ;;  %v548_v61 = vadd.f32 %v532_v60, %v468_v20 }
  0x55   : > { %950 = vperm.xlu1 %1596, %v2204_v50   ;;  %v585_v33 = vadd.f32 %v569_v23, %v489_v10  ;;  %v882_v34 = vsel %vm836_vm1, %v853_v41, 0.0  ;;  %v796_v13 = vsel %vm755_vm0, 0.0, %v756_v38  ;;  %v458_v43 = vmul.f32 %v1609_v63, %v1737_v1 }
  0x56   : > { %v479_v26 = vmul.f32 %v1609_v63, %v1745_v2  ;;  %v522_v53 = vmul.f32 %v1755_v4, %v1823_v25  ;;  %v804_v36 = vadd.f32 %v796_v13, %v686_v21  ;;  %v839_v45 = vsel %vm836_vm1, %v837_v14, %v838_v29 }
  0x57   : > { %v660_v49 = vadd.f32 %v644_v57, %v548_v61  ;;  %v697_v24 = vadd.f32 %v681_v22, %v585_v33  ;;  %v559_v12 = vmul.f32 %v1761_v5, %v1823_v25  ;;  %v634_v41 = vmul.f32 %v1778_v7, %v1794_v11  ;;  %v1612_v33 = vld [vmem:[%s2259_s16] sm:%s2244_s15] }
  0x58   : > { %v538_v51 = vadd.f32 %v522_v53, %v458_v43  ;;  %v671_v52 = vmul.f32 %v1783_v8, %v1794_v11  ;;  %v2233_v63 = vadd.f32 %v839_v45, %v804_v36  ;;  %v877_v15 = vsel %vm836_vm1, %v838_v29, 0.0 }
  0x59   : > { %v772_v62 = vrot.slane %v660_v49, 7  ;;  %v470_v39 = vmul.f32 %v1737_v1, %v1967_v32  ;;  %v575_v20 = vadd.f32 %v559_v12, %v479_v26  ;;  %v491_v25 = vmul.f32 %v1745_v2, %v1967_v32 }
  0x5a   : > { %v650_v16 = vadd.f32 %v634_v41, %v538_v51  ;;  %v534_v21 = vmul.f32 %v1755_v4, %v2037_v37  ;;  %905 = vperm.xlu0 %1597, %v2233_v63   ;;  %v571_v19 = vmul.f32 %v1761_v5, %v2037_v37  ;;  %v646_v10 = vmul.f32 %v1778_v7, %v2114_v55 }
  0x5b   : > { %v773_v11 = vsel %vm755_vm0, %v771_v31, %v772_v62  ;;  %v683_v32 = vmul.f32 %v1783_v8, %v2114_v55  ;;  %v687_v17 = vadd.f32 %v671_v52, %v575_v20  ;;  %v883_v14 = vsel %vm836_vm1, %v856_v54, 0.0  ;;  %v1615_v52 = vld [vmem:[%s2259_s16 + $0x8] sm:%s2244_s15] }
  0x5c   : > { %v815_v58 = vadd.f32 %v773_v11, %v697_v24  ;;  %v757_v60 = vrot.slane %v650_v16, 7  ;;  %v550_v23 = vadd.f32 %v534_v21, %v470_v39  ;;  %v587_v31 = vadd.f32 %v571_v19, %v491_v25 }
  0x5d   : > { %v471_v57 = vmul.f32 %v1737_v1, %v2020_v28  ;;  %v492_v26 = vmul.f32 %v1745_v2, %v2020_v28  ;;  %v513_v53 = vmul.f32 %v1750_v3, %v2020_v28  ;;  %v514_v54 = vmul.f32 %v1750_v3, %v2037_v37 }
  0x5e   : > { %v2266_v22 = vadd.f32 %v882_v34, %v815_v58  ;;  %v758_v29 = vsel %vm755_vm0, %v756_v38, %v757_v60  ;;  %v662_v61 = vadd.f32 %v646_v10, %v550_v23  ;;  %v699_v43 = vadd.f32 %v683_v32, %v587_v31 }
  0x5f   : > { %v805_v13 = vadd.f32 %v758_v29, %v687_v17  ;;  %v535_v38 = vmul.f32 %v1755_v4, %v2100_v47  ;;  %v572_v34 = vmul.f32 %v1761_v5, %v2100_v47  ;;  %v609_v45 = vmul.f32 %v1766_v6, %v2100_v47 }
  0x60   : > { %960 = vperm.xlu1 %1596, %v2266_v22   ;;  %v775_v44 = vrot.slane %v662_v61, 7  ;;  %v610_v28 = vmul.f32 %v1766_v6, %v2114_v55  ;;  %v647_v49 = vmul.f32 %v1612_v33, %v1778_v7  ;;  %v684_v12 = vmul.f32 %v1612_v33, %v1783_v8 }
  0x61   : > { %v2282_v36 = vadd.f32 %v877_v15, %v805_v13  ;;  %v551_v24 = vadd.f32 %v535_v38, %v471_v57  ;;  %v588_v51 = vadd.f32 %v572_v34, %v492_v26  ;;  %v625_v62 = vadd.f32 %v609_v45, %v513_v53  ;;  %v2387_v34 = vld [vmem:[%s2610_s4] ss:$0 sm:$0xff] }
  0x62   : > { %v776_v3 = vsel %vm755_vm0, %v774_v0, %v775_v44  ;;  %v626_v15 = vadd.f32 %v610_v28, %v514_v54  ;;  %v721_v47 = vmul.f32 %v1612_v33, %v1788_v9  ;;  %v722_v20 = vmul.f32 %v1615_v52, %v1788_v9 }
  0x63   : > { %910 = vperm.xlu0 %1597, %v2282_v36   ;;  %v817_v41 = vadd.f32 %v776_v3, %v699_v43  ;;  %v663_v39 = vadd.f32 %v647_v49, %v551_v24  ;;  %v700_v6 = vadd.f32 %v684_v12, %v588_v51  ;;  %v472_v48 = vmul.f32 %v1737_v1, %v2037_v37 }
  0x64   : > { %v737_v16 = vadd.f32 %v721_v47, %v625_v62  ;;  %v493_v25 = vmul.f32 %v1745_v2, %v2037_v37  ;;  %v536_v21 = vmul.f32 %v1755_v4, %v2114_v55  ;;  %v738_v11 = vadd.f32 %v722_v20, %v626_v15 }
  0x65   : > { %v2300_v0 = vadd.f32 %v883_v14, %v817_v41  ;;  %v777_v19 = vrot.slane %v663_v39, 7  ;;  %v573_v10 = vmul.f32 %v1761_v5, %v2114_v55  ;;  %v648_v32 = vmul.f32 %v1615_v52, %v1778_v7 }
  0x66   : > { %v858_v9 = vrot.slane %v737_v16, 1  ;;  %v552_v1 = vadd.f32 %v536_v21, %v472_v48  ;;  %v685_v58 = vmul.f32 %v1615_v52, %v1783_v8  ;;  %v859_v60 = vrot.slane %v738_v11, 1 }
  0x67   : > { %970 = vperm.xlu1 %1596, %v2300_v0   ;;  %v803_v17 = vsel %vm755_vm0, 0.0, %v777_v19  ;;  %v589_v2 = vadd.f32 %v573_v10, %v493_v25  ;;  %v1657_v29 = vmov 1   ;;  %v1658_v61 = vmov 2  }
  0x68   : > { %v818_v37 = vadd.f32 %v803_v17, %v700_v6  ;;  %v664_v23 = vadd.f32 %v648_v32, %v552_v1  ;;  %v860_v4 = vsel %vm836_vm1, %v858_v9, %v859_v60  ;;  %v884_v55 = vsel %vm836_vm1, %v859_v60, 0.0 }
  0x69   : > { %v701_v31 = vadd.f32 %v685_v58, %v589_v2  ;;  %v1659_v33 = vmov 3  }
  0x6a   : > { %v2313_v14 = vadd.f32 %v860_v4, %v818_v37  ;;  %v778_v5 = vrot.slane %v664_v23, 7 }
  0x6c   : > { %975 = vperm.xlu0 %1597, %v2313_v14   ;;  %v779_v7 = vsel %vm755_vm0, %v777_v19, %v778_v5 }
  0x6d   : > { %v819_v57 = vadd.f32 %v779_v7, %v701_v31 }
  0x6f   : > { %v900_v8 = vadd.f32 %v884_v55, %v819_v57 }
  0x70   : > { %1598 = vset.pattern.permute.xlu0 %v1657_v29 }
  0x71   : > { %980 = vperm.xlu1 %1596, %v900_v8   ;;  %1005 = vperm.xlu0 %1598, %v2233_v63  }
  0x75   : > { %1599 = vset.pattern.permute.xlu1 %v1657_v29  ;;  %1017 = vperm.xlu0 %1598, %v1994_v56  }
  0x76   : > { %1009 = vperm.xlu1 %1599, %v2282_v36  }
  0x79   : > { %1025 = vperm.xlu0 %1598, %v2074_v27  }
  0x7a   : > { %1013 = vperm.xlu1 %1599, %v1918_v42  }
  0x7d   : > { %1033 = vperm.xlu0 %1598, %v2147_v40  }
  0x7e   : > { %1021 = vperm.xlu1 %1599, %v1887_v18  }
  0x81   : > { %1041 = vperm.xlu0 %1598, %v2204_v50  }
  0x82   : > { %1029 = vperm.xlu1 %1599, %v1964_v30  }
  0x85   : > { %1049 = vperm.xlu0 %1598, %v2266_v22  }
  0x86   : > { %1037 = vperm.xlu1 %1599, %v2034_v35  }
  0x89   : > { %1057 = vperm.xlu0 %1598, %v2300_v0  }
  0x8a   : > { %1045 = vperm.xlu1 %1599, %v2111_v59  }
  0x8d   : > { %1065 = vperm.xlu0 %1598, %v900_v8  }
  0x8e   : > { %1053 = vperm.xlu1 %1599, %v2175_v46  }
  0x91   : > { %1601 = vset.pattern.permute.xlu0 %v1658_v61 }
  0x92   : > { %1061 = vperm.xlu1 %1599, %v2313_v14   ;;  %1110 = vperm.xlu0 %1601, %v2282_v36  }
  0x96   : > { %1600 = vset.pattern.permute.xlu1 %v1658_v61  ;;  %1122 = vperm.xlu0 %1601, %v1887_v18  }
  0x97   : > { %1106 = vperm.xlu1 %1600, %v2233_v63  }
  0x9a   : > { %1130 = vperm.xlu0 %1601, %v1964_v30  }
  0x9b   : > { %1114 = vperm.xlu1 %1600, %v1918_v42  }
  0x9e   : > { %1138 = vperm.xlu0 %1601, %v2034_v35  }
  0x9f   : > { %1118 = vperm.xlu1 %1600, %v1994_v56   ;;  %v926_v13 = vpop.permute.xlu0 %925 }
  0xa0   : > { %v991_v15 = vmul.f32 %v2387_v34, %v926_v13 }
  0xa2   : > { %1146 = vperm.xlu0 %1601, %v2111_v59  }
  0xa3   : > { %1126 = vperm.xlu1 %1600, %v2074_v27  }
  0xa4   : > { %v916_v43 = vpop.permute.xlu1 %915 }
  0xa5   : > { %v989_v51 = vmul.f32 %v2387_v34, %v916_v43 }
  0xa6   : > { %1154 = vperm.xlu0 %1601, %v2175_v46  }
  0xa7   : > { %1134 = vperm.xlu1 %1600, %v2147_v40  }
  0xaa   : > { %1162 = vperm.xlu0 %1601, %v2313_v14  }
  0xab   : > { %1142 = vperm.xlu1 %1600, %v2204_v50  }
  0xae   : > { %1602 = vset.pattern.permute.xlu0 %v1659_v33 }
  0xaf   : > { %1150 = vperm.xlu1 %1600, %v2266_v22   ;;  %1207 = vperm.xlu0 %1602, %v2233_v63   ;;  %v936_v63 = vpop.permute.xlu0 %935 }
  0xb0   : > { %v993_v48 = vmul.f32 %v2387_v34, %v936_v63 }
  0xb3   : > { %1158 = vperm.xlu1 %1600, %v2300_v0   ;;  %1219 = vperm.xlu0 %1602, %v1994_v56   ;;  %v2359_v56 = vpop.permute.xlu1 %920 }
  0xb7   : > { %1166 = vperm.xlu1 %1600, %v900_v8   ;;  %1227 = vperm.xlu0 %1602, %v2074_v27   ;;  %v946_v27 = vpop.permute.xlu0 %945 }
  0xb8   : > { %v995_v11 = vmul.f32 %v2387_v34, %v946_v27 }
  0xbb   : > { %1603 = vset.pattern.permute.xlu1 %v1659_v33  ;;  %1235 = vperm.xlu0 %1602, %v2147_v40   ;;  %v2362_v40 = vpop.permute.xlu1 %930 }
  0xbc   : > { %1211 = vperm.xlu1 %1603, %v2282_v36  }
  0xbf   : > { %1243 = vperm.xlu0 %1602, %v2204_v50  }
  0xc0   : > { %1215 = vperm.xlu1 %1603, %v1918_v42   ;;  %v956_v50 = vpop.permute.xlu0 %955 }
  0xc1   : > { %v997_v1 = vmul.f32 %v2387_v34, %v956_v50 }
  0xc3   : > { %1251 = vperm.xlu0 %1602, %v2266_v22  }
  0xc4   : > { %1223 = vperm.xlu1 %1603, %v1887_v18  }
  0xc5   : > { %v2366_v42 = vpop.permute.xlu1 %940 }
  0xc7   : > { %1259 = vperm.xlu0 %1602, %v2300_v0  }
  0xc8   : > { %1231 = vperm.xlu1 %1603, %v1964_v30  }
  0xca   : > { %v966_v18 = vpop.permute.xlu0 %965 }
  0xcb   : > { %1267 = vperm.xlu0 %1602, %v900_v8   ;;  %v999_v37 = vmul.f32 %v2387_v34, %v966_v18  ;;  %v2444_v18 = vld [vmem:[%s2610_s4 + $0x2] ss:$0 sm:$0xff] }
  0xcc   : > { %1239 = vperm.xlu1 %1603, %v2034_v35  }
  0xd0   : > { %1247 = vperm.xlu1 %1603, %v2111_v59   ;;  %v2369_v22 = vpop.permute.xlu1 %950 }
  0xd4   : > { %1255 = vperm.xlu1 %1603, %v2175_v46   ;;  %v2382_v46 = vld [vmem:[%s2610_s4 + $0x1] ss:$0 sm:$0xff] }
  0xd5   : > { %v2371_v30 = vpop.permute.xlu0 %905 }
  0xd8   : > { %1263 = vperm.xlu1 %1603, %v2313_v14  }
  0xdb   : > { %v2373_v26 = vpop.permute.xlu1 %960 }
  0xde   : > { %v911_v53 = vpop.permute.xlu0 %910 }
  0xdf   : > { %v988_v45 = vmul.f32 %v2387_v34, %v911_v53 }
  0xe2   : > { %v2375_v35 = vpop.permute.xlu1 %970 }
  0xe7   : > { %v976_v44 = vpop.permute.xlu0 %975 }
  0xe8   : > { %v1001_v5 = vmul.f32 %v2387_v34, %v976_v44 }
  0xec   : > { %v2377_v54 = vpop.permute.xlu1 %980  ;;  %v1006_v59 = vpop.permute.xlu0 %1005 }
  0xed   : > { %v1072_v53 = vmul.f32 %v2382_v46, %v1006_v59  ;;  %v990_v59 = vmul.f32 %v2387_v34, %v2359_v56 }
  0xf0   : > { %v1018_v38 = vpop.permute.xlu0 %1017 }
  0xf1   : > { %v1010_v36 = vpop.permute.xlu1 %1009 }
  0xf2   : > { %v1073_v28 = vmul.f32 %v2382_v46, %v1010_v36 }
  0xf4   : > { %v2391_v49 = vadd.f32 %v1073_v28, %v988_v45  ;;  %v1026_v3 = vpop.permute.xlu0 %1025  ;;  %v987_v45 = vmul.f32 %v2387_v34, %v2371_v30 }
  0xf5   : > { %v1014_v24 = vpop.permute.xlu1 %1013 }
  0xf6   : > { %v1074_v12 = vmul.f32 %v2382_v46, %v1014_v24  ;;  %v2455_v24 = vld [vmem:[%s2610_s4 + $0x3] ss:$0 sm:$0xff] }
  0xf8   : > { %v2395_v41 = vadd.f32 %v1074_v12, %v989_v51  ;;  %v2397_v52 = vpop.permute.xlu0 %1033  ;;  %v1088_v51 = vadd.f32 %v1072_v53, %v987_v45  ;;  %v1075_v12 = vmul.f32 %v2382_v46, %v1018_v38  ;;  %v992_v38 = vmul.f32 %v2387_v34, %v2362_v40 }
  0xf9   : > { %v1022_v62 = vpop.permute.xlu1 %1021  ;;  %v1079_v40 = vmul.f32 %v2382_v46, %v2397_v52 }
  0xfa   : > { %v1076_v47 = vmul.f32 %v2382_v46, %v1022_v62 }
  0xfc   : > { %v2401_v39 = vadd.f32 %v1076_v47, %v991_v15  ;;  %v2403_v6 = vpop.permute.xlu0 %1041 }
  0xfd   : > { %v1030_v20 = vpop.permute.xlu1 %1029  ;;  %v1081_v52 = vmul.f32 %v2382_v46, %v2403_v6 }
  0xfe   : > { %v1078_v0 = vmul.f32 %v2382_v46, %v1030_v20 }
 0x100   : > { %v2407_v16 = vadd.f32 %v1078_v0, %v993_v48  ;;  %v2409_v25 = vpop.permute.xlu0 %1049  ;;  %v2465_v48 = vld [vmem:[%s2611_s5] ss:$0 sm:$0xff]  ;;  %v1091_v0 = vadd.f32 %v1075_v12, %v990_v59 }
 0x101   : > { %v1038_v21 = vpop.permute.xlu1 %1037 }
 0x102   : > { %v1080_v19 = vmul.f32 %v2382_v46, %v1038_v21  ;;  %v1077_v21 = vmul.f32 %v2382_v46, %v1026_v3 }
 0x104   : > { %v2413_v10 = vadd.f32 %v1080_v19, %v995_v11  ;;  %v2415_v32 = vpop.permute.xlu0 %1057 }
 0x105   : > { %v1046_v9 = vpop.permute.xlu1 %1045 }
 0x106   : > { %v1082_v58 = vmul.f32 %v2382_v46, %v1046_v9 }
 0x108   : > { %v2419_v17 = vadd.f32 %v1082_v58, %v997_v1  ;;  %v2421_v60 = vpop.permute.xlu0 %1065 }
 0x109   : > { %v1054_v2 = vpop.permute.xlu1 %1053 }
 0x10a   : > { %v1084_v23 = vmul.f32 %v2382_v46, %v1054_v2  ;;  %v1093_v2 = vadd.f32 %v1077_v21, %v992_v38 }
 0x10c   : > { %v2425_v4 = vadd.f32 %v1084_v23, %v999_v37  ;;  %v994_v23 = vmul.f32 %v2387_v34, %v2366_v42 }
 0x10d   : > { %v1062_v31 = vpop.permute.xlu1 %1061  ;;  %v1111_v14 = vpop.permute.xlu0 %1110 }
 0x10e   : > { %v1086_v7 = vmul.f32 %v2382_v46, %v1062_v31  ;;  %v1174_v53 = vmul.f32 %v2444_v18, %v1111_v14  ;;  %v1095_v45 = vadd.f32 %v1079_v40, %v994_v23  ;;  %v1000_v40 = vmul.f32 %v2387_v34, %v2375_v35 }
 0x110   : > { %v2429_v55 = vadd.f32 %v1086_v7, %v1001_v5 }
 0x111   : > { %v2431_v57 = vpop.permute.xlu0 %1122 }
 0x112   : > { %v1107_v8 = vpop.permute.xlu1 %1106 }
 0x113   : > { %v1173_v28 = vmul.f32 %v2444_v18, %v1107_v8 }
 0x115   : > { %v2433_v29 = vpop.permute.xlu0 %1130  ;;  %v1189_v47 = vadd.f32 %v1173_v28, %v1088_v51  ;;  %v996_v28 = vmul.f32 %v2387_v34, %v2369_v22 }
 0x116   : > { %v1115_v61 = vpop.permute.xlu1 %1114 }
 0x119   : > { %v2435_v33 = vpop.permute.xlu0 %1138 }
 0x11a   : > { %v1119_v13 = vpop.permute.xlu1 %1118 }
 0x11b   : > { %v1176_v20 = vmul.f32 %v2444_v18, %v1119_v13 }
 0x11d   : > { %v2437_v43 = vpop.permute.xlu0 %1146  ;;  %v1192_v9 = vadd.f32 %v1176_v20, %v1091_v0  ;;  %v1175_v20 = vmul.f32 %v2444_v18, %v1115_v61  ;;  %v1083_v0 = vmul.f32 %v2382_v46, %v2409_v25  ;;  %v1177_v25 = vmul.f32 %v2444_v18, %v2431_v57 }
 0x11e   : > { %v1127_v63 = vpop.permute.xlu1 %1126 }
 0x11f   : > { %v1178_v1 = vmul.f32 %v2444_v18, %v1127_v63 }
 0x121   : > { %v2439_v27 = vpop.permute.xlu0 %1154  ;;  %v1194_v7 = vadd.f32 %v1178_v1, %v1093_v2  ;;  %v1191_v1 = vadd.f32 %v1175_v20, %v2395_v41  ;;  %v1085_v2 = vmul.f32 %v2382_v46, %v2415_v32 }
 0x122   : > { %v1135_v50 = vpop.permute.xlu1 %1134 }
 0x123   : > { %v1180_v8 = vmul.f32 %v2444_v18, %v1135_v50 }
 0x125   : > { %v2447_v44 = vpop.permute.xlu0 %1162  ;;  %v1196_v12 = vadd.f32 %v1180_v8, %v1095_v45  ;;  %v1193_v8 = vadd.f32 %v1177_v25, %v2401_v39  ;;  %v1087_v45 = vmul.f32 %v2382_v46, %v2421_v60 }
 0x126   : > { %v1143_v36 = vpop.permute.xlu1 %1142 }
 0x127   : > { %v1182_v50 = vmul.f32 %v2444_v18, %v1143_v36  ;;  %v998_v36 = vmul.f32 %v2387_v34, %v2373_v26 }
 0x12a   : > { %v1151_v62 = vpop.permute.xlu1 %1150  ;;  %v1208_v15 = vpop.permute.xlu0 %1207 }
 0x12b   : > { %v1274_v30 = vmul.f32 %v2455_v24, %v1208_v15 }
 0x12d   : > { %v1290_v11 = vadd.f32 %v1274_v30, %v1189_v47  ;;  %v1190_v47 = vadd.f32 %v1174_v53, %v2391_v49  ;;  %v1097_v30 = vadd.f32 %v1081_v52, %v996_v28  ;;  %v1184_v49 = vmul.f32 %v2444_v18, %v1151_v62 }
 0x12e   : > { %v1159_v19 = vpop.permute.xlu1 %1158  ;;  %v1220_v56 = vpop.permute.xlu0 %1219  ;;  %v1101_v53 = vadd.f32 %v1085_v2, %v1000_v40  ;;  %v1002_v52 = vmul.f32 %v2387_v34, %v2377_v54 }
 0x12f   : > { %v1312_v58 = vadd.f32 %v2465_v48, %v1290_v11  ;;  %v1277_v3 = vmul.f32 %v2455_v24, %v1220_v56  ;;  %v1198_v38 = vadd.f32 %v1182_v50, %v1097_v30  ;;  %v1186_v23 = vmul.f32 %v2444_v18, %v1159_v19 }
 0x130   : > { %v1181_v50 = vmul.f32 %v2444_v18, %v2435_v33  ;;  %v1183_v30 = vmul.f32 %v2444_v18, %v2437_v43 }
 0x131   : > { %1329 = vst.msk [vmem:[%s2475_s14] sm:$0xff] %vm1328_vm2, %v1312_v58  ;;  %v1293_v37 = vadd.f32 %v1277_v3, %v1192_v9  ;;  %v1099_v3 = vadd.f32 %v1083_v0, %v998_v36 }
 0x132   : > { %v2486_v31 = vpop.permute.xlu1 %1166  ;;  %v1228_v5 = vpop.permute.xlu0 %1227 }
 0x133   : > { %v1315_v13 = vadd.f32 %v2465_v48, %v1293_v37  ;;  %v1279_v63 = vmul.f32 %v2455_v24, %v1228_v5  ;;  %v1200_v37 = vadd.f32 %v1184_v49, %v1099_v3  ;;  %v1188_v28 = vmul.f32 %v2444_v18, %v2486_v31 }
 0x134   : > { %v1199_v49 = vadd.f32 %v1183_v30, %v2419_v17  ;;  %v1187_v17 = vmul.f32 %v2444_v18, %v2447_v44 }
 0x135   : > { %1332 = vst.msk [vmem:[%s2475_s14 + $0x18] sm:$0xff] %vm1328_vm2, %v1315_v13  ;;  %v1295_v42 = vadd.f32 %v1279_v63, %v1194_v7  ;;  %v1179_v13 = vmul.f32 %v2444_v18, %v2433_v29 }
 0x136   : > { %v1236_v51 = vpop.permute.xlu0 %1235  ;;  %v1203_v3 = vadd.f32 %v1187_v17, %v2429_v55 }
 0x137   : > { %v1317_v15 = vadd.f32 %v2465_v48, %v1295_v42  ;;  %v1212_v59 = vpop.permute.xlu1 %1211  ;;  %v1281_v14 = vmul.f32 %v2455_v24, %v1236_v51  ;;  %v1202_v42 = vadd.f32 %v1186_v23, %v1101_v53  ;;  %v1195_v60 = vadd.f32 %v1179_v13, %v2407_v16 }
 0x138   : > { %v1275_v6 = vmul.f32 %v2455_v24, %v1212_v59 }
 0x139   : > { %1334 = vst.msk [vmem:[%s2475_s14 + $0x28] sm:$0xff] %vm1328_vm2, %v1317_v15  ;;  %v1297_v22 = vadd.f32 %v1281_v14, %v1196_v12  ;;  %v1103_v15 = vadd.f32 %v1087_v45, %v1002_v52 }
 0x13a   : > { %v1291_v21 = vadd.f32 %v1275_v6, %v1190_v47  ;;  %v1244_v11 = vpop.permute.xlu0 %1243  ;;  %v1197_v6 = vadd.f32 %v1181_v50, %v2413_v10  ;;  %v1185_v10 = vmul.f32 %v2444_v18, %v2439_v27 }
 0x13b   : > { %v1319_v61 = vadd.f32 %v2465_v48, %v1297_v22  ;;  %v1216_v56 = vpop.permute.xlu1 %1215  ;;  %v1283_v9 = vmul.f32 %v2455_v24, %v1244_v11  ;;  %v1204_v47 = vadd.f32 %v1188_v28, %v1103_v15 }
 0x13c   : > { %v1313_v58 = vadd.f32 %v2465_v48, %v1291_v21  ;;  %v1276_v26 = vmul.f32 %v2455_v24, %v1216_v56  ;;  %v1201_v25 = vadd.f32 %v1185_v10, %v2425_v4 }
 0x13d   : > { %1336 = vst.msk [vmem:[%s2475_s14 + $0x38] sm:$0xff] %vm1328_vm2, %v1319_v61  ;;  %v1299_v62 = vadd.f32 %v1283_v9, %v1198_v38 }
 0x13e   : > { %1330 = vst.msk [vmem:[%s2475_s14 + $0x8] sm:$0xff] %vm1328_vm2, %v1313_v58  ;;  %v1292_v57 = vadd.f32 %v1276_v26, %v1191_v1  ;;  %v1252_v41 = vpop.permute.xlu0 %1251 }
 0x13f   : > { %v1321_v5 = vadd.f32 %v2465_v48, %v1299_v62  ;;  %v1224_v7 = vpop.permute.xlu1 %1223  ;;  %v1285_v32 = vmul.f32 %v2455_v24, %v1252_v41 }
 0x140   : > { %v1314_v35 = vadd.f32 %v2465_v48, %v1292_v57  ;;  %v1278_v63 = vmul.f32 %v2455_v24, %v1224_v7 }
 0x141   : > { %1338 = vst.msk [vmem:[%s2475_s14 + $0x48] sm:$0xff] %vm1328_vm2, %v1321_v5  ;;  %v1301_v19 = vadd.f32 %v1285_v32, %v1200_v37 }
 0x142   : > { %1331 = vst.msk [vmem:[%s2475_s14 + $0x10] sm:$0xff] %vm1328_vm2, %v1314_v35  ;;  %v1294_v39 = vadd.f32 %v1278_v63, %v1193_v8  ;;  %v1260_v29 = vpop.permute.xlu0 %1259 }
 0x143   : > { %v1323_v51 = vadd.f32 %v2465_v48, %v1301_v19  ;;  %v1232_v12 = vpop.permute.xlu1 %1231  ;;  %v1287_v46 = vmul.f32 %v2455_v24, %v1260_v29 }
 0x144   : > { %v1316_v54 = vadd.f32 %v2465_v48, %v1294_v39  ;;  %v1280_v34 = vmul.f32 %v2455_v24, %v1232_v12 }
 0x145   : > { %1340 = vst.msk [vmem:[%s2475_s14 + $0x58] sm:$0xff] %vm1328_vm2, %v1323_v51  ;;  %v1303_v31 = vadd.f32 %v1287_v46, %v1202_v42 }
 0x146   : > { %1333 = vst.msk [vmem:[%s2475_s14 + $0x20] sm:$0xff] %vm1328_vm2, %v1316_v54  ;;  %v1296_v59 = vadd.f32 %v1280_v34, %v1195_v60  ;;  %v1268_v14 = vpop.permute.xlu0 %1267 }
 0x147   : > { %v1325_v16 = vadd.f32 %v2465_v48, %v1303_v31  ;;  %v1240_v20 = vpop.permute.xlu1 %1239  ;;  %v1289_v33 = vmul.f32 %v2455_v24, %v1268_v14 }
 0x148   : > { %v1318_v0 = vadd.f32 %v2465_v48, %v1296_v59  ;;  %v1282_v22 = vmul.f32 %v2455_v24, %v1240_v20 }
 0x149   : > { %1342 = vst.msk [vmem:[%s2475_s14 + $0x68] sm:$0xff] %vm1328_vm2, %v1325_v16  ;;  %v1305_v36 = vadd.f32 %v1289_v33, %v1204_v47 }
 0x14a   : > { %1335 = vst.msk [vmem:[%s2475_s14 + $0x30] sm:$0xff] %vm1328_vm2, %v1318_v0  ;;  %v1298_v21 = vadd.f32 %v1282_v22, %v1197_v6 }
 0x14b   : > { %v1327_v11 = vadd.f32 %v2465_v48, %v1305_v36  ;;  %v1248_v38 = vpop.permute.xlu1 %1247 }
 0x14c   : > { %v1320_v43 = vadd.f32 %v2465_v48, %v1298_v21  ;;  %v1284_v61 = vmul.f32 %v2455_v24, %v1248_v38 }
 0x14d   : > { %1344 = vst.msk [vmem:[%s2475_s14 + $0x78] sm:$0xff] %vm1328_vm2, %v1327_v11 }
 0x14e   : > { %1337 = vst.msk [vmem:[%s2475_s14 + $0x40] sm:$0xff] %vm1328_vm2, %v1320_v43  ;;  %v1300_v56 = vadd.f32 %v1284_v61, %v1199_v49 }
 0x14f   : > { %v1256_v9 = vpop.permute.xlu1 %1255 }
 0x150   : > { %v1322_v1 = vadd.f32 %v2465_v48, %v1300_v56  ;;  %v1286_v27 = vmul.f32 %v2455_v24, %v1256_v9 }
 0x152   : > { %1339 = vst.msk [vmem:[%s2475_s14 + $0x50] sm:$0xff] %vm1328_vm2, %v1322_v1  ;;  %v1302_v58 = vadd.f32 %v1286_v27, %v1201_v25 }
 0x153   : > { %v1264_v26 = vpop.permute.xlu1 %1263 }
 0x154   : > { %v1324_v2 = vadd.f32 %v2465_v48, %v1302_v58  ;;  %v1288_v62 = vmul.f32 %v2455_v24, %v1264_v26 }
 0x156   : > { %1341 = vst.msk [vmem:[%s2475_s14 + $0x60] sm:$0xff] %vm1328_vm2, %v1324_v2  ;;  %v1304_v4 = vadd.f32 %v1288_v62, %v1203_v3 }
 0x158   : > { %v1326_v40 = vadd.f32 %v2465_v48, %v1304_v4 }
 0x15a   : > { %1343 = vst.msk [vmem:[%s2475_s14 + $0x70] sm:$0xff] %vm1328_vm2, %v1326_v40 }
 0x15b PF: > { %s16_s25 = sadd.s32 1, %s1654_s25   ;;  %s2614_s21 = smov %s1646_s23 }
 0x15c   : > { %p13_p12 = scmp.ge.s32.totalorder %s16_s25, 6   ;;  %s2615_s22 = smov %s1650_s24 }
 0x15d   : > { %s2616_s23 = smov %s2619_s26  ;;  %s2617_s24 = smov %s2623_s27 }
 0x15e   :  { %15 = sbr.rel (!%p13_p12) target bundleno = 3 (0x3), region = 82 }

</bundles_post_ra>
